<compile_context>
chip_gen: v7x
topology: tpu7x:2x2x1
jax: 0.10.0
libtpu: 0.0.40
codegen_flags: <defaults>
</compile_context>

<pallas_src>
import jax
import jax.numpy as jnp
from jax.experimental import pallas as pl
from jax.experimental.pallas import tpu as pltpu


# ---------------- model hyper-parameters (small, consistent w/ module) -------
INPUT_SIZE = 64        # decoder vocab (embedding rows)
EMBED_SIZE = 32        # embedding_size
HIDDEN_SIZE = 32       # hidden_size
OUTPUT_SIZE = 128      # len(english.vocab)  (fc out features)
NUM_LAYERS = 2
BATCH = 8              # N  (decoder is called with a batch of single tokens)
SEQ_LEN = 8            # demo length for the fused multi-step variant

assert 4 * HIDDEN_SIZE == 128 and OUTPUT_SIZE == 128  # single 128-lane slab

# ---------------- merged weight-slab layout (rows are 8-aligned) -------------
_H = HIDDEN_SIZE
SLAB_COLS = 128
L0_W_ROWS = INPUT_SIZE + _H                       # 96  rows 0..95 : [Emb@Wih0^T ; Whh0^T]
L0_HH_OFF = INPUT_SIZE                            # 64  Whh0^T starts here
L0_B_ROW = L0_W_ROWS                              # 96  combined bias layer 0
L1_OFF = ((L0_B_ROW + 1 + 7) // 8) * 8            # 104
L1_W_ROWS = 2 * _H                                # 64  rows 104..167 : [Wih1^T ; Whh1^T]
L1_B_ROW = L1_OFF + L1_W_ROWS                     # 168 combined bias layer 1
FC_OFF = ((L1_B_ROW + 1 + 7) // 8) * 8            # 176 rows 176..207 : W_fc^T
FC_B_ROW = FC_OFF + _H                            # 208 fc bias row
SLAB_ROWS = ((FC_B_ROW + 1 + 7) // 8) * 8         # 216


def _gate_mask(shape_rows):
    """Bool mask selecting the 'g' gate lanes (2H..3H) of a (rows, 4H) vreg."""
    lane = jax.lax.broadcasted_iota(jnp.int32, (shape_rows, 4 * _H), 1)
    return jnp.logical_and(lane >= 2 * _H, lane < 3 * _H)


def _lstm_cell(pre_gates, c_prev, is_g):
    """pre_gates already has i/f/o columns scaled by 0.5 (sigmoid via tanh)."""
    H = HIDDEN_SIZE
    t = jnp.tanh(pre_gates)                       # single EUP push per layer
    act = jnp.where(is_g, t, 0.5 * t + 0.5)       # sigmoid(z) = 0.5*tanh(z/2)+0.5
    i = act[:, 0:H]
    f = act[:, H:2 * H]
    g = act[:, 2 * H:3 * H]
    o = act[:, 3 * H:4 * H]
    c_new = f * c_prev + i * g
    h_new = o * jnp.tanh(c_new)
    return h_new, c_new


# =========================== single-step kernel ==============================
def decoder_step_kernel(tok_ref, h_ref, c_ref, w_ref, pred_ref, h_out_ref, c_out_ref):
    H = HIDDEN_SIZE

    h0 = h_ref[0]
    h1 = h_ref[1]
    c0 = c_ref[0]
    c1 = c_ref[1]

    # one-hot tokens: embedding lookup is folded into the layer-0 input weights
    tok = tok_ref[...]                                          # (B, 1) int32
    lane = jax.lax.broadcasted_iota(jnp.int32, (BATCH, INPUT_SIZE), 1)
    onehot = (lane == tok).astype(jnp.float32)                  # (B, INPUT_SIZE)

    is_g = _gate_mask(BATCH)

    # ---- LSTM layer 0 (embedding + input projection fused into one matmul) --
    xh0 = jnp.concatenate([onehot, h0], axis=1)                 # (B, VI + H)
    pre0 = (jnp.dot(xh0, w_ref[0:L0_W_ROWS, :], preferred_element_type=jnp.float32)
            + w_ref[L0_B_ROW:L0_B_ROW + 1, :])
    h0n, c0n = _lstm_cell(pre0, c0, is_g)

    # ---- LSTM layer 1 (inter-layer dropout = identity in eval mode) ---------
    xh1 = jnp.concatenate([h0n, h1], axis=1)                    # (B, 2H)
    pre1 = (jnp.dot(xh1, w_ref[L1_OFF:L1_OFF + L1_W_ROWS, :],
                    preferred_element_type=jnp.float32)
            + w_ref[L1_B_ROW:L1_B_ROW + 1, :])
    h1n, c1n = _lstm_cell(pre1, c1, is_g)

    # ---- fc on the top-layer output (lane-dense (B,128) store) --------------
    pred_ref[...] = (jnp.dot(h1n, w_ref[FC_OFF:FC_OFF + H, :],
                             preferred_element_type=jnp.float32)
                     + w_ref[FC_B_ROW:FC_B_ROW + 1, :])

    # ---- new state straight into the (L,B,H) output refs --------------------
    h_out_ref[0] = h0n
    h_out_ref[1] = h1n
    c_out_ref[0] = c0n
    c_out_ref[1] = c1n


@jax.jit
def decoder_forward(x_tokens, hidden, cell, w_slab):
    """Mirrors Decoder.forward(x, hidden, cell) -> (predictions, hidden, cell)."""
    tok = x_tokens.astype(jnp.int32).reshape(BATCH, 1)
    vmem = pl.BlockSpec(memory_space=pltpu.MemorySpace.VMEM)

    pred, h_out, c_out = pl.pallas_call(
        decoder_step_kernel,
        out_shape=(
            jax.ShapeDtypeStruct((BATCH, OUTPUT_SIZE), jnp.float32),
            jax.ShapeDtypeStruct((NUM_LAYERS, BATCH, HIDDEN_SIZE), jnp.float32),
            jax.ShapeDtypeStruct((NUM_LAYERS, BATCH, HIDDEN_SIZE), jnp.float32),
        ),
        in_specs=[vmem, vmem, vmem, vmem],
        out_specs=(vmem, vmem, vmem),
        # recycle the hidden/cell HBM buffers in place every decode step
        input_output_aliases={1: 1, 2: 2},
    )(tok, hidden, cell, w_slab)
    return pred, h_out, c_out


# ================== fused multi-step (teacher-forced) kernel =================
def decoder_seq_kernel(xproj_ref, h_init_ref, c_init_ref, w_ref,
                       pred_ref, h_out_ref, c_out_ref, h_scr, c_scr):
    H = HIDDEN_SIZE
    t = pl.program_id(0)

    @pl.when(t == 0)
    def _():
        h_scr[...] = h_init_ref[...]
        c_scr[...] = c_init_ref[...]

    is_g = _gate_mask(BATCH)

    h0 = h_scr[0]
    h1 = h_scr[1]
    c0 = c_scr[0]
    c1 = c_scr[1]

    # layer 0: embedding projection precomputed (gather from folded slab), so
    # only the K=32 recurrent matmul runs here.
    pre0 = (xproj_ref[0]
            + jnp.dot(h0, w_ref[L0_HH_OFF:L0_HH_OFF + H, :],
                      preferred_element_type=jnp.float32)
            + w_ref[L0_B_ROW:L0_B_ROW + 1, :])
    h0n, c0n = _lstm_cell(pre0, c0, is_g)

    xh1 = jnp.concatenate([h0n, h1], axis=1)
    pre1 = (jnp.dot(xh1, w_ref[L1_OFF:L1_OFF + L1_W_ROWS, :],
                    preferred_element_type=jnp.float32)
            + w_ref[L1_B_ROW:L1_B_ROW + 1, :])
    h1n, c1n = _lstm_cell(pre1, c1, is_g)

    # per-step logits, time-blocked lane-dense (1,B,128) store
    # TODO(synk): for long sequences the FC could be deferred and batched over T.
    pred_ref[0] = (jnp.dot(h1n, w_ref[FC_OFF:FC_OFF + H, :],
                           preferred_element_type=jnp.float32)
                   + w_ref[FC_B_ROW:FC_B_ROW + 1, :])

    h_scr[0] = h0n
    h_scr[1] = h1n
    c_scr[0] = c0n
    c_scr[1] = c1n

    @pl.when(t == pl.num_programs(0) - 1)
    def _():
        h_out_ref[...] = h_scr[...]
        c_out_ref[...] = c_scr[...]


@jax.jit
def decoder_forward_seq(tok_seq, hidden, cell, w_slab):
    """Equivalent to calling Decoder.forward T times (teacher forcing), fused
    into one pallas_call so launch + weight-DMA cost is paid once per sequence."""
    T = tok_seq.shape[0]
    H = HIDDEN_SIZE
    # layer-0 input projection for all T steps: gather rows of the folded
    # (pre-scaled) Emb @ W_ih0^T table that lives in the slab.
    xproj = jnp.take(w_slab[0:INPUT_SIZE, :], tok_seq.astype(jnp.int32), axis=0)

    state_spec = pl.BlockSpec((NUM_LAYERS, BATCH, H), lambda t: (0, 0, 0))

    preds, h_out, c_out = pl.pallas_call(
        decoder_seq_kernel,
        out_shape=(
            jax.ShapeDtypeStruct((T, BATCH, OUTPUT_SIZE), jnp.float32),
            jax.ShapeDtypeStruct((NUM_LAYERS, BATCH, H), jnp.float32),
            jax.ShapeDtypeStruct((NUM_LAYERS, BATCH, H), jnp.float32),
        ),
        grid_spec=pltpu.PrefetchScalarGridSpec(
            num_scalar_prefetch=0,
            grid=(T,),
            in_specs=[
                pl.BlockSpec((1, BATCH, 4 * H), lambda t: (t, 0, 0)),   # xproj_t
                state_spec,                                             # h init
                state_spec,                                             # c init
                pl.BlockSpec((SLAB_ROWS, SLAB_COLS), lambda t: (0, 0)), # weights resident
            ],
            out_specs=[
                pl.BlockSpec((1, BATCH, OUTPUT_SIZE), lambda t: (t, 0, 0)),
                state_spec,
                state_spec,
            ],
            scratch_shapes=[
                pltpu.VMEM((NUM_LAYERS, BATCH, H), jnp.float32),
                pltpu.VMEM((NUM_LAYERS, BATCH, H), jnp.float32),
            ],
        ),
        compiler_params=pltpu.CompilerParams(dimension_semantics=("arbitrary",)),
    )(xproj, hidden, cell, w_slab)
    return preds, h_out, c_out


# ============================ params & reference =============================
def init_params(key):
    """PyTorch-style init; returns (merged kernel slab, raw reference params)."""
    ks = jax.random.split(key, 11)
    H, E, V, VI = HIDDEN_SIZE, EMBED_SIZE, OUTPUT_SIZE, INPUT_SIZE
    s = 1.0 / (H ** 0.5)
    hi = jax.lax.Precision.HIGHEST

    def u(k, shape):
        return jax.random.uniform(k, shape, jnp.float32, -s, s)

    embedding = jax.random.normal(ks[0], (VI, E), jnp.float32)
    w_ih0 = u(ks[1], (4 * H, E))
    w_hh0 = u(ks[2], (4 * H, H))
    b0 = u(ks[3], (4 * H,)) + u(ks[4], (4 * H,))     # b_ih + b_hh combined
    w_ih1 = u(ks[5], (4 * H, H))
    w_hh1 = u(ks[6], (4 * H, H))
    b1 = u(ks[7], (4 * H,)) + u(ks[8], (4 * H,))
    w_fc = u(ks[9], (V, H))
    b_fc = u(ks[10], (V,))

    # fold embedding into layer-0 input weights and stack [W_ih^T ; W_hh^T]
    emb_fold = jnp.dot(embedding, w_ih0.T, precision=hi)                  # (VI, 4H)
    w0_stacked = jnp.concatenate([emb_fold, w_hh0.T], axis=0)             # (VI+H, 4H)
    w1_stacked = jnp.concatenate([w_ih1.T, w_hh1.T], axis=0)              # (2H, 4H)

    # pre-scale i/f/o gate columns by 0.5 -> sigmoid(z) = 0.5*tanh(gates)+0.5
    col = jnp.arange(4 * H)
    gate_scale = jnp.where((col >= 2 * H) & (col < 3 * H), 1.0, 0.5).astype(jnp.float32)
    w0s, b0s = w0_stacked * gate_scale, b0 * gate_scale
    w1s, b1s = w1_stacked * gate_scale, b1 * gate_scale

    slab = jnp.zeros((SLAB_ROWS, SLAB_COLS), jnp.float32)
    slab = slab.at[0:L0_W_ROWS, :].set(w0s)
    slab = slab.at[L0_B_ROW, :].set(b0s)
    slab = slab.at[L1_OFF:L1_OFF + L1_W_ROWS, :].set(w1s)
    slab = slab.at[L1_B_ROW, :].set(b1s)
    slab = slab.at[FC_OFF:FC_OFF + H, :].set(w_fc.T)
    slab = slab.at[FC_B_ROW, :].set(b_fc)

    raw = {"embedding": embedding,
           "w_ih0": w_ih0, "w_hh0": w_hh0, "b0": b0,
           "w_ih1": w_ih1, "w_hh1": w_hh1, "b1": b1,
           "w_fc": w_fc, "b_fc": b_fc}
    return slab, raw


def decoder_reference(x_tokens, hidden, cell, raw):
    """Pure-JAX reference matching PyTorch LSTM/Linear semantics (f32, HIGHEST)."""
    H = HIDDEN_SIZE
    hi = jax.lax.Precision.HIGHEST
    emb = raw["embedding"][x_tokens]                      # (B, E)

    def step(x, h, c, w_ih, w_hh, b):
        gates = (jnp.dot(x, w_ih.T, precision=hi)
                 + jnp.dot(h, w_hh.T, precision=hi) + b)
        i = jax.nn.sigmoid(gates[:, 0 * H:1 * H])
        f = jax.nn.sigmoid(gates[:, 1 * H:2 * H])
        g = jnp.tanh(gates[:, 2 * H:3 * H])
        o = jax.nn.sigmoid(gates[:, 3 * H:4 * H])
        c_new = f * c + i * g
        h_new = o * jnp.tanh(c_new)
        return h_new, c_new

    h0, c0 = step(emb, hidden[0], cell[0], raw["w_ih0"], raw["w_hh0"], raw["b0"])
    h1, c1 = step(h0, hidden[1], cell[1], raw["w_ih1"], raw["w_hh1"], raw["b1"])
    pred = jnp.dot(h1, raw["w_fc"].T, precision=hi) + raw["b_fc"]
    return pred, jnp.stack([h0, h1]), jnp.stack([c0, c1])


# ================================= demo ======================================
if __name__ == "__main__":
    key = jax.random.PRNGKey(0)
    k_par, k_tok, k_h, k_c, k_seq = jax.random.split(key, 5)

    w_slab, raw = init_params(k_par)

    x_tokens = jax.random.randint(k_tok, (BATCH,), 0, INPUT_SIZE, dtype=jnp.int32)
    hidden = jax.random.normal(k_h, (NUM_LAYERS, BATCH, HIDDEN_SIZE), jnp.float32)
    cell = jax.random.normal(k_c, (NUM_LAYERS, BATCH, HIDDEN_SIZE), jnp.float32)

    # ---- single decode step (matches Decoder.forward semantics) -------------
    pred, h_out, c_out = decoder_forward(x_tokens, hidden, cell, w_slab)
    jax.block_until_ready((pred, h_out, c_out))

    assert pred.shape == (BATCH, OUTPUT_SIZE)
    assert h_out.shape == (NUM_LAYERS, BATCH, HIDDEN_SIZE)
    assert c_out.shape == (NUM_LAYERS, BATCH, HIDDEN_SIZE)

    pred_r, h_r, c_r = decoder_reference(x_tokens, hidden, cell, raw)
    err_p = float(jnp.max(jnp.abs(pred - pred_r)))
    err_h = float(jnp.max(jnp.abs(h_out - h_r)))
    err_c = float(jnp.max(jnp.abs(c_out - c_r)))
    assert err_p < 2e-3 and err_h < 2e-3 and err_c < 2e-3, (err_p, err_h, err_c)

    # ---- fused multi-step decode (time loop inside one kernel launch) -------
    tok_seq = jax.random.randint(k_seq, (SEQ_LEN, BATCH), 0, INPUT_SIZE, dtype=jnp.int32)
    preds_s, h_s, c_s = decoder_forward_seq(tok_seq, hidden, cell, w_slab)
    jax.block_until_ready((preds_s, h_s, c_s))

    assert preds_s.shape == (SEQ_LEN, BATCH, OUTPUT_SIZE)
    h_ref, c_ref = hidden, cell
    preds_ref = []
    for t in range(SEQ_LEN):
        p_t, h_ref, c_ref = decoder_reference(tok_seq[t], h_ref, c_ref, raw)
        preds_ref.append(p_t)
    preds_ref = jnp.stack(preds_ref)
    err_ps = float(jnp.max(jnp.abs(preds_s - preds_ref)))
    err_hs = float(jnp.max(jnp.abs(h_s - h_ref)))
    err_cs = float(jnp.max(jnp.abs(c_s - c_ref)))
    assert err_ps < 5e-3 and err_hs < 5e-3 and err_cs < 5e-3, (err_ps, err_hs, err_cs)

    print("KERNEL_OK")
</pallas_src>

<mosaic_0001>
module attributes {stable_mosaic.version = 11 : i64} {
  func.func @decoder_step_kernel(%arg0: memref<8x1xi32, #tpu.memory_space<vmem>>, %arg1: memref<2x8x32xf32, #tpu.memory_space<vmem>>, %arg2: memref<2x8x32xf32, #tpu.memory_space<vmem>>, %arg3: memref<216x128xf32, #tpu.memory_space<vmem>>, %arg4: memref<8x128xf32, #tpu.memory_space<vmem>>, %arg5: memref<2x8x32xf32, #tpu.memory_space<vmem>>, %arg6: memref<2x8x32xf32, #tpu.memory_space<vmem>>) attributes {dimension_semantics = [], scalar_prefetch = 0 : i64, scratch_operands = 0 : i64, tpu.core_type = #tpu.core_type<tc>} {
    %c0 = arith.constant 0 : index
    %c0_0 = arith.constant 0 : index
    %c0_1 = arith.constant 0 : index
    %0 = vector.load %arg1[%c0, %c0_0, %c0_1] : memref<2x8x32xf32, #tpu.memory_space<vmem>>, vector<1x8x32xf32>
    %1 = vector.shape_cast %0 : vector<1x8x32xf32> to vector<8x32xf32>
    %c1 = arith.constant 1 : index
    %c0_2 = arith.constant 0 : index
    %c0_3 = arith.constant 0 : index
    %2 = vector.load %arg1[%c1, %c0_2, %c0_3] : memref<2x8x32xf32, #tpu.memory_space<vmem>>, vector<1x8x32xf32>
    %3 = vector.shape_cast %2 : vector<1x8x32xf32> to vector<8x32xf32>
    %c0_4 = arith.constant 0 : index
    %c0_5 = arith.constant 0 : index
    %c0_6 = arith.constant 0 : index
    %4 = vector.load %arg2[%c0_4, %c0_5, %c0_6] : memref<2x8x32xf32, #tpu.memory_space<vmem>>, vector<1x8x32xf32>
    %5 = vector.shape_cast %4 : vector<1x8x32xf32> to vector<8x32xf32>
    %c1_7 = arith.constant 1 : index
    %c0_8 = arith.constant 0 : index
    %c0_9 = arith.constant 0 : index
    %6 = vector.load %arg2[%c1_7, %c0_8, %c0_9] : memref<2x8x32xf32, #tpu.memory_space<vmem>>, vector<1x8x32xf32>
    %7 = vector.shape_cast %6 : vector<1x8x32xf32> to vector<8x32xf32>
    %c0_10 = arith.constant 0 : index
    %c0_11 = arith.constant 0 : index
    %8 = vector.load %arg0[%c0_10, %c0_11] : memref<8x1xi32, #tpu.memory_space<vmem>>, vector<8x1xi32>
    %9 = tpu.iota {dimensions = array<i32: 1>} : vector<8x64xi32>
    %10 = vector.broadcast %8 : vector<8x1xi32> to vector<8x64xi32>
    %11 = arith.cmpi eq, %9, %10 : vector<8x64xi32>
    %12 = arith.extui %11 : vector<8x64xi1> to vector<8x64xi32>
    %13 = arith.sitofp %12 : vector<8x64xi32> to vector<8x64xf32>
    %14 = tpu.iota {dimensions = array<i32: 1>} : vector<8x128xi32>
    %c64_i32 = arith.constant 64 : i32
    %15 = vector.broadcast %c64_i32 : i32 to vector<8x128xi32>
    %16 = arith.cmpi sge, %14, %15 : vector<8x128xi32>
    %c96_i32 = arith.constant 96 : i32
    %17 = vector.broadcast %c96_i32 : i32 to vector<8x128xi32>
    %18 = arith.cmpi slt, %14, %17 : vector<8x128xi32>
    %19 = arith.andi %16, %18 : vector<8x128xi1>
    %20 = tpu.concatenate %13, %1 in 1 : vector<8x64xf32>, vector<8x32xf32> -> vector<8x96xf32>
    %c0_12 = arith.constant 0 : index
    %c0_13 = arith.constant 0 : index
    %21 = vector.load %arg3[%c0_12, %c0_13] : memref<216x128xf32, #tpu.memory_space<vmem>>, vector<96x128xf32>
    %cst = arith.constant dense<0.000000e+00> : vector<8x128xf32>
    %22 = tpu.matmul %20, %21, %cst {dimension_numbers = #tpu.dot_dimension_numbers<[1], [0], [0], [1], [0, 0, 1, 1], [], []>} : vector<8x96xf32>, vector<96x128xf32>, vector<8x128xf32> -> vector<8x128xf32>
    %c96 = arith.constant 96 : index
    %c0_14 = arith.constant 0 : index
    %23 = vector.load %arg3[%c96, %c0_14] : memref<216x128xf32, #tpu.memory_space<vmem>>, vector<1x128xf32>
    %24 = vector.broadcast %23 : vector<1x128xf32> to vector<8x128xf32>
    %25 = arith.addf %22, %24 : vector<8x128xf32>
    %26 = math.tanh %25 : vector<8x128xf32>
    %cst_15 = arith.constant 5.000000e-01 : f32
    %27 = vector.broadcast %cst_15 : f32 to vector<8x128xf32>
    %28 = arith.mulf %27, %26 : vector<8x128xf32>
    %cst_16 = arith.constant 5.000000e-01 : f32
    %29 = vector.broadcast %cst_16 : f32 to vector<8x128xf32>
    %30 = arith.addf %28, %29 : vector<8x128xf32>
    %31 = arith.select %19, %26, %30 : vector<8x128xi1>, vector<8x128xf32>
    %32 = vector.extract_strided_slice %31 {offsets = [0, 0], sizes = [8, 32], strides = [1, 1]} : vector<8x128xf32> to vector<8x32xf32>
    %33 = vector.extract_strided_slice %31 {offsets = [0, 32], sizes = [8, 32], strides = [1, 1]} : vector<8x128xf32> to vector<8x32xf32>
    %34 = vector.extract_strided_slice %31 {offsets = [0, 64], sizes = [8, 32], strides = [1, 1]} : vector<8x128xf32> to vector<8x32xf32>
    %35 = vector.extract_strided_slice %31 {offsets = [0, 96], sizes = [8, 32], strides = [1, 1]} : vector<8x128xf32> to vector<8x32xf32>
    %36 = arith.mulf %33, %5 : vector<8x32xf32>
    %37 = arith.mulf %32, %34 : vector<8x32xf32>
    %38 = arith.addf %36, %37 : vector<8x32xf32>
    %39 = math.tanh %38 : vector<8x32xf32>
    %40 = arith.mulf %35, %39 : vector<8x32xf32>
    %41 = tpu.concatenate %40, %3 in 1 : vector<8x32xf32>, vector<8x32xf32> -> vector<8x64xf32>
    %c104 = arith.constant 104 : index
    %c0_17 = arith.constant 0 : index
    %42 = vector.load %arg3[%c104, %c0_17] : memref<216x128xf32, #tpu.memory_space<vmem>>, vector<64x128xf32>
    %cst_18 = arith.constant dense<0.000000e+00> : vector<8x128xf32>
    %43 = tpu.matmul %41, %42, %cst_18 {dimension_numbers = #tpu.dot_dimension_numbers<[1], [0], [0], [1], [0, 0, 1, 1], [], []>} : vector<8x64xf32>, vector<64x128xf32>, vector<8x128xf32> -> vector<8x128xf32>
    %c168 = arith.constant 168 : index
    %c0_19 = arith.constant 0 : index
    %44 = vector.load %arg3[%c168, %c0_19] : memref<216x128xf32, #tpu.memory_space<vmem>>, vector<1x128xf32>
    %45 = vector.broadcast %44 : vector<1x128xf32> to vector<8x128xf32>
    %46 = arith.addf %43, %45 : vector<8x128xf32>
    %47 = math.tanh %46 : vector<8x128xf32>
    %cst_20 = arith.constant 5.000000e-01 : f32
    %48 = vector.broadcast %cst_20 : f32 to vector<8x128xf32>
    %49 = arith.mulf %48, %47 : vector<8x128xf32>
    %cst_21 = arith.constant 5.000000e-01 : f32
    %50 = vector.broadcast %cst_21 : f32 to vector<8x128xf32>
    %51 = arith.addf %49, %50 : vector<8x128xf32>
    %52 = arith.select %19, %47, %51 : vector<8x128xi1>, vector<8x128xf32>
    %53 = vector.extract_strided_slice %52 {offsets = [0, 0], sizes = [8, 32], strides = [1, 1]} : vector<8x128xf32> to vector<8x32xf32>
    %54 = vector.extract_strided_slice %52 {offsets = [0, 32], sizes = [8, 32], strides = [1, 1]} : vector<8x128xf32> to vector<8x32xf32>
    %55 = vector.extract_strided_slice %52 {offsets = [0, 64], sizes = [8, 32], strides = [1, 1]} : vector<8x128xf32> to vector<8x32xf32>
    %56 = vector.extract_strided_slice %52 {offsets = [0, 96], sizes = [8, 32], strides = [1, 1]} : vector<8x128xf32> to vector<8x32xf32>
    %57 = arith.mulf %54, %7 : vector<8x32xf32>
    %58 = arith.mulf %53, %55 : vector<8x32xf32>
    %59 = arith.addf %57, %58 : vector<8x32xf32>
    %60 = math.tanh %59 : vector<8x32xf32>
    %61 = arith.mulf %56, %60 : vector<8x32xf32>
    %c176 = arith.constant 176 : index
    %c0_22 = arith.constant 0 : index
    %62 = vector.load %arg3[%c176, %c0_22] : memref<216x128xf32, #tpu.memory_space<vmem>>, vector<32x128xf32>
    %cst_23 = arith.constant dense<0.000000e+00> : vector<8x128xf32>
    %63 = tpu.matmul %61, %62, %cst_23 {dimension_numbers = #tpu.dot_dimension_numbers<[1], [0], [0], [1], [0, 0, 1, 1], [], []>} : vector<8x32xf32>, vector<32x128xf32>, vector<8x128xf32> -> vector<8x128xf32>
    %c208 = arith.constant 208 : index
    %c0_24 = arith.constant 0 : index
    %64 = vector.load %arg3[%c208, %c0_24] : memref<216x128xf32, #tpu.memory_space<vmem>>, vector<1x128xf32>
    %65 = vector.broadcast %64 : vector<1x128xf32> to vector<8x128xf32>
    %66 = arith.addf %63, %65 : vector<8x128xf32>
    %c0_25 = arith.constant 0 : index
    %c0_26 = arith.constant 0 : index
    %67 = vector.load %arg4[%c0_25, %c0_26] : memref<8x128xf32, #tpu.memory_space<vmem>>, vector<8x128xf32>
    tpu.vector_store %arg4[%c0_25, %c0_26], %66 {strides = array<i32>} : memref<8x128xf32, #tpu.memory_space<vmem>>, vector<8x128xf32>,
    %c0_27 = arith.constant 0 : index
    %c0_28 = arith.constant 0 : index
    %c0_29 = arith.constant 0 : index
    %68 = vector.load %arg5[%c0_27, %c0_28, %c0_29] : memref<2x8x32xf32, #tpu.memory_space<vmem>>, vector<1x8x32xf32>
    %69 = vector.shape_cast %68 : vector<1x8x32xf32> to vector<8x32xf32>
    %70 = vector.shape_cast %40 : vector<8x32xf32> to vector<1x8x32xf32>
    tpu.vector_store %arg5[%c0_27, %c0_28, %c0_29], %70 {strides = array<i32>} : memref<2x8x32xf32, #tpu.memory_space<vmem>>, vector<1x8x32xf32>,
    %c1_30 = arith.constant 1 : index
    %c0_31 = arith.constant 0 : index
    %c0_32 = arith.constant 0 : index
    %71 = vector.load %arg5[%c1_30, %c0_31, %c0_32] : memref<2x8x32xf32, #tpu.memory_space<vmem>>, vector<1x8x32xf32>
    %72 = vector.shape_cast %71 : vector<1x8x32xf32> to vector<8x32xf32>
    %73 = vector.shape_cast %61 : vector<8x32xf32> to vector<1x8x32xf32>
    tpu.vector_store %arg5[%c1_30, %c0_31, %c0_32], %73 {strides = array<i32>} : memref<2x8x32xf32, #tpu.memory_space<vmem>>, vector<1x8x32xf32>,
    %c0_33 = arith.constant 0 : index
    %c0_34 = arith.constant 0 : index
    %c0_35 = arith.constant 0 : index
    %74 = vector.load %arg6[%c0_33, %c0_34, %c0_35] : memref<2x8x32xf32, #tpu.memory_space<vmem>>, vector<1x8x32xf32>
    %75 = vector.shape_cast %74 : vector<1x8x32xf32> to vector<8x32xf32>
    %76 = vector.shape_cast %38 : vector<8x32xf32> to vector<1x8x32xf32>
    tpu.vector_store %arg6[%c0_33, %c0_34, %c0_35], %76 {strides = array<i32>} : memref<2x8x32xf32, #tpu.memory_space<vmem>>, vector<1x8x32xf32>,
    %c1_36 = arith.constant 1 : index
    %c0_37 = arith.constant 0 : index
    %c0_38 = arith.constant 0 : index
    %77 = vector.load %arg6[%c1_36, %c0_37, %c0_38] : memref<2x8x32xf32, #tpu.memory_space<vmem>>, vector<1x8x32xf32>
    %78 = vector.shape_cast %77 : vector<1x8x32xf32> to vector<8x32xf32>
    %79 = vector.shape_cast %59 : vector<8x32xf32> to vector<1x8x32xf32>
    tpu.vector_store %arg6[%c1_36, %c0_37, %c0_38], %79 {strides = array<i32>} : memref<2x8x32xf32, #tpu.memory_space<vmem>>, vector<1x8x32xf32>,
    return
  }
}

</mosaic_0001>

<bundles_post_ra>
// kernel: decoder_forward.1
= control target key start
LH: loop header
LB: loop body
LE: loop exit
PB: predicated region body
PF: predicated region fallthrough
CT: control target
= control target key end

     0   :  { %12 = vsyncpa [#allocation3], 0  ;;  %s960_s0 = inlined_call_operand.vmem [shape: s32[8,1], index: 0, kind: input, shape index: {}]   ;;  %s961_s1 = inlined_call_operand.hbm [shape: f32[2,8,32], index: 1, kind: input, shape index: {}, may-alias: {1,5}]   ;;  %s962_s2 = inlined_call_operand.hbm [shape: f32[2,8,32], index: 2, kind: input, shape index: {}, may-alias: {2,6}]   ;;  %s963_s3 = inlined_call_operand.hbm [shape: f32[216,128], index: 3, kind: input, shape index: {}]   ;;  %s964_s4 = inlined_call_operand.hbm [shape: f32[8,128], index: 4, kind: output, shape index: {0}]   ;;  %s965_s5 = inlined_call_operand.hbm [shape: f32[2,8,32], index: 5, kind: output, shape index: {1}, may-alias: {1,5}]   ;;  %s966_s6 = inlined_call_operand.hbm [shape: f32[2,8,32], index: 6, kind: output, shape index: {2}, may-alias: {2,6}]  }
   0x1   :  { %13 = vsyncpa [#allocation6], 0 }
   0x2   :  { %14 = vsyncpa [#allocation4], 0 }
   0x3   :  { %15 = vsyncpa [#allocation10], 0  ;;  %s762_s21 = smov [#allocation5]   ;;  %s763_s23 = smov [#allocation2]  }
   0x4   :  { %s35_s22 = sshll.u32 %s762_s21, 4  ;;  %s23_s24 = sshll.u32 %s763_s23, 4  ;;  %s36_s22 = int_to_ptr.vmem [resolvable:$true] %s35_s22  ;;  %s812_s24 = int_to_ptr.vmem [resolvable:$true] %s23_s24 }
   0x5   :  { %s622_s27 = scalar_lea.hbm %s962_s2, 256 }
   0x6   :  { %p623_p0 = scmp.ne.s32.totalorder %s962_s2, %s622_s27  ;;  %p626_p1 = scmp.lt.u32.totalorder %s622_s27, %s962_s2 }
   0x8   :  { %p628_p2 = pnand %p626_p1, %p623_p0 }
   0xa   :  { %631 = shalt.err (!%p628_p2)
}
   0xb   :  { %s632_s8 = scalar_lea.vmem %s36_s22, 256  ;;  %p637_p4 = scmp.lt.s32.totalorder %s36_s22, %s36_s22 }
   0xc   :  { %p633_p3 = scmp.ne.s32.totalorder %s36_s22, %s632_s8  ;;  %p638_p5 = scmp.lt.s32.totalorder %s632_s8, %s632_s8 }
   0xe   :  { %p639_p6 = por %p638_p5, %p637_p4 }
  0x10   :  { %p640_p7 = pnand %p639_p6, %p633_p3 }
  0x12   :  { %643 = shalt.err (!%p640_p7)
}
  0x13   :  { %s764_s9 = smov 128   ;;  %s765_s10 = smov 8  }
  0x14   :  { %41 = dma.hbm_to_vmem [thread:$0]  %s962_s2, 256, %s36_s22, [#allocation6], %s764_s9, %s764_s9, %s765_s10  }
  0x15   :  { %s644_s15 = scalar_lea.hbm %s961_s1, 256 }
  0x16   :  { %p645_p8 = scmp.ne.s32.totalorder %s961_s1, %s644_s15  ;;  %p648_p9 = scmp.lt.u32.totalorder %s644_s15, %s961_s1 }
  0x18   :  { %p650_p10 = pnand %p648_p9, %p645_p8 }
  0x1a   :  { %653 = shalt.err (!%p650_p10)
}
  0x1b   :  { %s654_s20 = scalar_lea.vmem %s812_s24, 256  ;;  %p659_p12 = scmp.lt.s32.totalorder %s812_s24, %s812_s24 }
  0x1c   :  { %p655_p11 = scmp.ne.s32.totalorder %s812_s24, %s654_s20  ;;  %p660_p13 = scmp.lt.s32.totalorder %s654_s20, %s654_s20 }
  0x1e   :  { %p661_p0 = por %p660_p13, %p659_p12 }
  0x20   :  { %p662_p1 = pnand %p661_p0, %p655_p11 }
  0x22   :  { %665 = shalt.err (!%p662_p1)
}
  0x23   :  { %29 = dma.hbm_to_vmem [thread:$0]  %s961_s1, 256, %s812_s24, [#allocation3], %s764_s9, %s764_s9, %s765_s10  }
  0x24   :  { %s766_s22 = smov [#allocation7]   ;;  %s666_s27 = scalar_lea.hbm %s963_s3, 3456 }
  0x25   :  { %s47_s23 = sshll.u32 %s766_s22, 4  ;;  %p667_p2 = scmp.ne.s32.totalorder %s963_s3, %s666_s27  ;;  %s48_s23 = int_to_ptr.vmem [resolvable:$true] %s47_s23 }
  0x26   :  { %p670_p3 = scmp.lt.u32.totalorder %s666_s27, %s963_s3 }
  0x28   :  { %p672_p4 = pnand %p670_p3, %p667_p2 }
  0x2a   :  { %675 = shalt.err (!%p672_p4)
}
  0x2b   :  { %s676_s8 = scalar_lea.vmem %s48_s23, 3456  ;;  %p681_p6 = scmp.lt.s32.totalorder %s48_s23, %s48_s23 }
  0x2c   :  { %p677_p5 = scmp.ne.s32.totalorder %s48_s23, %s676_s8  ;;  %p682_p7 = scmp.lt.s32.totalorder %s676_s8, %s676_s8 }
  0x2e   :  { %p683_p8 = por %p682_p7, %p681_p6 }
  0x30   :  { %p684_p9 = pnand %p683_p8, %p677_p5 }
  0x32   :  { %687 = shalt.err (!%p684_p9)
}
  0x33   :  { %53 = dma.hbm_to_vmem [thread:$0]  %s963_s3, 3456, %s48_s23, [#allocation6], %s764_s9, %s764_s9, %s765_s10  }
  0x34   :  { %754 = dma.done.wait [#allocation3], 256  }
  0x35   :  { %755 = vsyncadd [#allocation3], 4294967040 }
  0x36   :  { %756 = dma.done.wait [#allocation6], 3712  }
  0x37   :  { %757 = vsyncadd [#allocation6], 4294963584  ;;  %v767_v0 = vmov 0   ;;  %v768_v1 = vmov 0.0|0.0   ;;  %v69_v2 = vld [vmem:[%s960_s0] sm:$0xff]  ;;  %v88_v4 = vld [vmem:[#allocation7 + $0x8] sm:$0xff]  ;;  %v70_v23 = vlaneseq }
  0x38   :  { %613 = vset.pattern.permute.xlu0 %v767_v0  ;;  %562 = vmatprep.subr.bf16.mxu0 %v768_v1  ;;  %v87_v3 = vld [vmem:[#allocation7] sm:$0xff]  ;;  %v89_v5 = vld [vmem:[#allocation7 + $0x10] sm:$0xff]  ;;  %v90_v6 = vld [vmem:[#allocation7 + $0x18] sm:$0xff]  ;;  %s769_s3 = smov 64   ;;  %vm770_vm0 = vmmov 0   ;;  %v771_v12 = vmov 0.0  }
  0x39   :  { %580 = vmatprep.subr.bf16.mxu1 %v768_v1  ;;  %73 = vperm.xlu0 %613, %v69_v2   ;;  %v63_v7 = vld [vmem:[#allocation2] sm:$0xff]  ;;  %v563_v8 = vpack.c.bf16 %v88_v4, %v87_v3  ;;  %v566_v9 = vpack.c.bf16 %v90_v6, %v89_v5  ;;  %v92_v11 = vld [vmem:[#allocation7 + $0x28] sm:$0xff]  ;;  %v93_v14 = vld [vmem:[#allocation7 + $0x30] sm:$0xff]  ;;  %v71_v24 = vand.u32 127, %v70_v23  ;;  %vm85_vm2 = vcmask 523264   ;;  %s772_s0 = smov 32  }
  0x3a   :  { %v91_v10 = vld [vmem:[#allocation7 + $0x20] sm:$0xff]  ;;  %529 = vmatprep.mubr.msk.f32.mxu0 %vm770_vm0, %v771_v12  ;;  %548 = vmatprep.mubr.msk.f32.mxu1 %vm770_vm0, %v771_v12  ;;  %v94_v15 = vld [vmem:[#allocation7 + $0x38] sm:$0xff]  ;;  %v96_v18 = vld [vmem:[#allocation7 + $0x48] sm:$0xff]  ;;  %vm104_vm3 = vcmask 785408   ;;  %vm211_vm7 = vcmask 261120   ;;  %s773_s13 = smov 96  }
  0x3b   :  { %564 = vmatpush3.bf16.msra.mxu0 %v563_v8  ;;  %v569_v13 = vpack.c.bf16 %v92_v11, %v91_v10  ;;  %v572_v16 = vpack.c.bf16 %v94_v15, %v93_v14  ;;  %v95_v17 = vld [vmem:[#allocation7 + $0x40] sm:$0xff]  ;;  %v97_v20 = vld [vmem:[#allocation7 + $0x50] sm:$0xff]  ;;  %v98_v21 = vld [vmem:[#allocation7 + $0x58] sm:$0xff]  ;;  %vm78_vm4 = vcmp.ge.s32.totalorder %v71_v24, 64  ;;  %vm79_vm5 = vcmp.lt.s32.totalorder %v71_v24, 96  ;;  %s774_s14 = smov [#allocation9]  }
  0x3c   :  { %565 = vmatprep.subr.bf16.mxu0 %v768_v1  ;;  %v575_v19 = vpack.c.bf16 %v96_v18, %v95_v17  ;;  %v578_v22 = vpack.c.bf16 %v98_v21, %v97_v20  ;;  %v472_v29 = vld [vmem:[#allocation7 + $0x60] ss:$0 sm:$0xff]  ;;  %vm881_vm6 = vmand %vm78_vm4, %vm79_vm5  ;;  %v66_v38 = vld [vmem:[#allocation5] sm:$0xff]  ;;  %s439_s15 = sshll.u32 %s774_s14, 4  ;;  %s440_s15 = int_to_ptr.vmem [resolvable:$true] %s439_s15 }
  0x3d   :  { %82 = vrot.lane.b32.xlu0 %v63_v7, %s769_s3  ;;  %v213_v45 = vld [vmem:[#allocation7 + $0x68] sm:$0xff]  ;;  %v214_v46 = vld [vmem:[#allocation7 + $0x70] sm:$0xff]  ;;  %v215_v47 = vld [vmem:[#allocation7 + $0x78] sm:$0xff]  ;;  %s688_s16 = scalar_lea.vmem %s440_s15, 256  ;;  %p693_p11 = scmp.lt.s32.totalorder %s440_s15, %s440_s15 }
  0x3e   :  { %v581_v48 = vpack.c.bf16 %v214_v46, %v213_v45  ;;  %v216_v49 = vld [vmem:[#allocation7 + $0x80] sm:$0xff]  ;;  %v217_v51 = vld [vmem:[#allocation7 + $0x88] sm:$0xff]  ;;  %v218_v52 = vld [vmem:[#allocation7 + $0x90] sm:$0xff]  ;;  %p689_p10 = scmp.ne.s32.totalorder %s440_s15, %s688_s16  ;;  %p694_p12 = scmp.lt.s32.totalorder %s688_s16, %s688_s16 }
  0x3f   :  { %567 = vmatpush3.bf16.msra.mxu0 %v566_v9  ;;  %v584_v50 = vpack.c.bf16 %v216_v49, %v215_v47  ;;  %v587_v53 = vpack.c.bf16 %v218_v52, %v217_v51  ;;  %v219_v54 = vld [vmem:[#allocation7 + $0x98] sm:$0xff]  ;;  %v220_v55 = vld [vmem:[#allocation7 + $0xa0] sm:$0xff]  ;;  %v65_v58 = vld [vmem:[#allocation2 + $0x8] sm:$0xff] }
  0x40   :  { %568 = vmatprep.subr.bf16.mxu0 %v768_v1  ;;  %582 = vmatpush3.bf16.msra.mxu1 %v581_v48  ;;  %v590_v57 = vpack.c.bf16 %v220_v55, %v219_v54  ;;  %v68_v59 = vld [vmem:[#allocation5 + $0x8] sm:$0xff]  ;;  %v474_v2 = vld [vmem:[#allocation7 + $0xa8] ss:$0 sm:$0xff]  ;;  %v326_v18 = vld [vmem:[#allocation7 + $0xc0] sm:$0xff]  ;;  %p695_p13 = por %p694_p12, %p693_p11 }
  0x41   :  { %583 = vmatprep.subr.bf16.mxu1 %v768_v1  ;;  %v325_v17 = vld [vmem:[#allocation7 + $0xb8] sm:$0xff]  ;;  %v327_v20 = vld [vmem:[#allocation7 + $0xc8] sm:$0xff] }
  0x42   :  { %v596_v21 = vpack.c.bf16 %v327_v20, %v326_v18  ;;  %p696_p0 = pnand %p695_p13, %p689_p10 }
  0x43   :  { %570 = vmatpush3.bf16.msra.mxu0 %v569_v13 }
  0x44   :  { %571 = vmatprep.subr.bf16.mxu0 %v768_v1  ;;  %585 = vmatpush3.bf16.msra.mxu1 %v584_v50 }
  0x45   :  { %586 = vmatprep.subr.bf16.mxu1 %v768_v1 }
  0x47   :  { %573 = vmatpush3.bf16.msra.mxu0 %v572_v16  ;;  %v324_v16 = vld [vmem:[#allocation7 + $0xb0] sm:$0xff] }
  0x48   :  { %574 = vmatprep.subr.bf16.mxu0 %v768_v1  ;;  %588 = vmatpush3.bf16.msra.mxu1 %v587_v53 }
  0x49   :  { %589 = vmatprep.subr.bf16.mxu1 %v768_v1 }
  0x4b   :  { %576 = vmatpush3.bf16.msra.mxu0 %v575_v19  ;;  %v593_v19 = vpack.c.bf16 %v325_v17, %v324_v16 }
  0x4c   :  { %577 = vmatprep.subr.bf16.mxu0 %v768_v1  ;;  %591 = vmatpush3.bf16.msra.mxu1 %v590_v57 }
  0x4d   :  { %592 = vmatprep.subr.bf16.mxu1 %v768_v1 }
  0x4f   :  { %579 = vmatpush3.bf16.msra.mxu0 %v578_v22 }
  0xb8   :  { %v74_v25 = vpop.permute.xlu0 %73 }
  0xb9   :  { %vm75_vm1 = vcmp.eq.s32.totalorder %v71_v24, %v74_v25 }
  0xba   :  { %v471_v26 = vsel %vm75_vm1, 1.0, %v771_v12 }
  0xbc   :  { %v83_v27 = vpop.permute.xlu0 %82 }
  0xbd   :  { %v86_v28 = vsel %vm85_vm2, %v471_v26, %v83_v27 }
  0xbe   :  { %530 = vmatmul.mubr.msk.f32.vlgmr.msra.gmra.mrb[0].mxu0 %vm104_vm3, %v86_v28 }
 0x191   :  { %v174_v30 = vpop.f32.mrb[0].mxu0 }
 0x192   :  { %v175_v31 = vadd.f32 %v472_v29, %v174_v30  ;;  %v531_v32 = vpop.f32.mrb[1].mxu0 }
 0x194   :  { %614 = vtanh.f32 %v175_v31 }
 0x19e   :  { %v615_v33 = vpop.eup %614 }
 0x19f   :  { %v179_v34 = vmul.f32 0.5, %v615_v33 }
 0x1a1   :  { %v180_v36 = vadd.f32 0.5, %v179_v34 }
 0x1a3   :  { %v181_v37 = vsel %vm881_vm6, %v615_v33, %v180_v36 }
 0x1a4   :  { %188 = vrot.lane.b32.xlu1 %v181_v37, %s769_s3 }
 0x1a8   :  { %183 = vrot.lane.b32.xlu1 %v66_v38, %s772_s0 }
 0x216   :  { %v189_v39 = vpop.permute.xlu1 %188 }
 0x217   :  { %v191_v40 = vmul.f32 %v189_v39, %v181_v37 }
 0x219   :  { %193 = vrot.lane.b32.xlu0 %v191_v40, %s772_s0 }
 0x21a   :  { %v184_v41 = vpop.permute.xlu1 %183 }
 0x21b   :  { %v186_v42 = vmul.f32 %v184_v41, %v181_v37 }
 0x28b   :  { %v194_v43 = vpop.permute.xlu0 %193 }
 0x28c   :  { %v890_v44 = vadd.f32 %v194_v43, %v186_v42 }
 0x28e   :  { %616 = vtanh.f32 %v890_v44 }
 0x298   :  { %v617_v56 = vpop.eup %616 }
 0x299   :  { %199 = vrot.lane.b32.xlu1 %v617_v56, %s769_s3 }
 0x29d   :  { %208 = vrot.lane.b32.xlu1 %v65_v58, %s772_s0 }
 0x2a1   :  { %304 = vrot.lane.b32.xlu1 %v68_v59, %s772_s0 }
 0x30b   :  { %v200_v60 = vpop.permute.xlu1 %199 }
 0x30c   :  { %v202_v61 = vmul.f32 %v200_v60, %v181_v37 }
 0x30e   :  { %204 = vrot.lane.b32.xlu0 %v202_v61, %s772_s0 }
 0x30f   :  { %v209_v62 = vpop.permute.xlu1 %208 }
 0x313   :  { %v305_v13 = vpop.permute.xlu1 %304 }
 0x380   :  { %v205_v63 = vpop.permute.xlu0 %204 }
 0x381   :  { %409 = vst.msk [vmem:[#allocation9] sm:$0xff] %vm211_vm7, %v205_v63  ;;  %v212_v0 = vsel %vm211_vm7, %v205_v63, %v209_v62 }
 0x382   :  { %549 = vmatmul.mubr.msk.f32.vlgmr.msra.gmra.mrb[0].mxu1 %vm85_vm2, %v212_v0 }
 0x383   :  { %559 = vmatprep.mubr.msk.f32.mxu1 %vm770_vm0, %v771_v12  ;;  %594 = vmatpush3.bf16.msra.mxu1 %v593_v19 }
 0x384   :  { %595 = vmatprep.subr.bf16.mxu1 %v768_v1 }
 0x387   :  { %597 = vmatpush3.bf16.msra.mxu1 %v596_v21 }
 0x455   :  { %v295_v3 = vpop.f32.mrb[0].mxu1 }
 0x456   :  { %v296_v4 = vadd.f32 %v474_v2, %v295_v3  ;;  %v550_v5 = vpop.f32.mrb[1].mxu1 }
 0x458   :  { %618 = vtanh.f32 %v296_v4 }
 0x462   :  { %v619_v6 = vpop.eup %618 }
 0x463   :  { %v300_v7 = vmul.f32 0.5, %v619_v6 }
 0x465   :  { %v301_v8 = vadd.f32 0.5, %v300_v7 }
 0x467   :  { %v302_v9 = vsel %vm881_vm6, %v619_v6, %v301_v8 }
 0x468   :  { %309 = vrot.lane.b32.xlu0 %v302_v9, %s769_s3  ;;  %v307_v14 = vmul.f32 %v305_v13, %v302_v9 }
 0x4da   :  { %v310_v10 = vpop.permute.xlu0 %309 }
 0x4db   :  { %v312_v11 = vmul.f32 %v310_v10, %v302_v9 }
 0x4dd   :  { %314 = vrot.lane.b32.xlu0 %v312_v11, %s772_s0 }
 0x54f   :  { %v315_v12 = vpop.permute.xlu0 %314 }
 0x550   :  { %v317_v15 = vadd.f32 %v315_v12, %v307_v14 }
 0x552   :  { %620 = vtanh.f32 %v317_v15 }
 0x55c   :  { %v621_v22 = vpop.eup %620 }
 0x55d   :  { %320 = vrot.lane.b32.xlu1 %v621_v22, %s769_s3 }
 0x561   :  { %414 = vrot.lane.b32.xlu1 %v890_v44, %s773_s13 }
 0x5cf   :  { %v321_v23 = vpop.permute.xlu1 %320 }
 0x5d0   :  { %v323_v24 = vmul.f32 %v321_v23, %v302_v9 }
 0x5d2   :  { %334 = vrot.lane.b32.xlu0 %v323_v24, %s772_s0 }
 0x5d3   :  { %v415_v25 = vpop.permute.xlu1 %414 }
 0x5d4   :  { %417 = vst.msk [vmem:[#allocation11] sm:$0xff] %vm211_vm7, %v415_v25 }
 0x5d6   :  { %419 = vrot.lane.b32.xlu0 %v317_v15, %s773_s13 }
 0x644   :  { %v335_v26 = vpop.permute.xlu0 %334 }
 0x645   :  { %412 = vst.msk [vmem:[#allocation9 + $0x8] sm:$0xff] %vm211_vm7, %v335_v26  ;;  %560 = vmatmul.mubr.msk.f32.vlgmr.msra.gmra.mrb[2].mxu1 %vm211_vm7, %v335_v26 }
 0x648   :  { %v420_v1 = vpop.permute.xlu0 %419 }
 0x649   :  { %423 = vst.msk [vmem:[#allocation11 + $0x8] sm:$0xff] %vm211_vm7, %v420_v1 }
 0x64a   :  { %699 = shalt.err (!%p696_p0)
}
 0x64b   :  { %s700_s19 = scalar_lea.hbm %s965_s5, 256 }
 0x64c   :  { %p701_p1 = scmp.ne.s32.totalorder %s965_s5, %s700_s19  ;;  %p704_p2 = scmp.lt.u32.totalorder %s700_s19, %s965_s5 }
 0x64e   :  { %p706_p3 = pnand %p704_p2, %p701_p1 }
 0x650   :  { %709 = shalt.err (!%p706_p3)
}
 0x651   :  { %445 = dma.vmem_to_hbm [thread:$0]  %s440_s15, 256, %s965_s5, [#allocation10], %s764_s9, %s764_s9, %s765_s10  }
 0x652   :  { %s775_s26 = smov [#allocation11]  }
 0x653   :  { %s451_s27 = sshll.u32 %s775_s26, 4  ;;  %s452_s27 = int_to_ptr.vmem [resolvable:$true] %s451_s27 }
 0x654   :  { %s710_s28 = scalar_lea.vmem %s452_s27, 256  ;;  %p715_p5 = scmp.lt.s32.totalorder %s452_s27, %s452_s27 }
 0x655   :  { %p711_p4 = scmp.ne.s32.totalorder %s452_s27, %s710_s28  ;;  %p716_p6 = scmp.lt.s32.totalorder %s710_s28, %s710_s28 }
 0x657   :  { %p717_p7 = por %p716_p6, %p715_p5 }
 0x659   :  { %p718_p8 = pnand %p717_p7, %p711_p4 }
 0x65b   :  { %721 = shalt.err (!%p718_p8)
}
 0x65c   :  { %s722_s7 = scalar_lea.hbm %s966_s6, 256 }
 0x65d   :  { %p723_p9 = scmp.ne.s32.totalorder %s966_s6, %s722_s7  ;;  %p726_p10 = scmp.lt.u32.totalorder %s722_s7, %s966_s6 }
 0x65f   :  { %p728_p11 = pnand %p726_p10, %p723_p9 }
 0x661   :  { %731 = shalt.err (!%p728_p11)
}
 0x662   :  { %457 = dma.vmem_to_hbm [thread:$0]  %s452_s27, 256, %s966_s6, [#allocation10], %s764_s9, %s764_s9, %s765_s10   ;;  %v476_v27 = vld [vmem:[#allocation7 + $0xd0] ss:$0 sm:$0xff] }
 0x663   :  { %s776_s3 = smov [#allocation8]  }
 0x664   :  { %s430_s0 = sshll.u32 %s776_s3, 4  ;;  %s431_s0 = int_to_ptr.vmem [resolvable:$true] %s430_s0 }
 0x665   :  { %s732_s13 = scalar_lea.vmem %s431_s0, 128  ;;  %p737_p13 = scmp.lt.s32.totalorder %s431_s0, %s431_s0 }
 0x666   :  { %p733_p12 = scmp.ne.s32.totalorder %s431_s0, %s732_s13  ;;  %p738_p0 = scmp.lt.s32.totalorder %s732_s13, %s732_s13 }
 0x668   :  { %p739_p1 = por %p738_p0, %p737_p13 }
 0x66a   :  { %p740_p2 = pnand %p739_p1, %p733_p12 }
 0x718   :  { %v404_v28 = vpop.f32.mrb[2].mxu1 }
 0x719   :  { %v405_v29 = vadd.f32 %v476_v27, %v404_v28  ;;  %v561_v30 = vpop.f32.mrb[3].mxu1 }
 0x71b   :  { %408 = vst [vmem:[#allocation8] sm:$0xff] %v405_v29 }
 0x71c   :  { %743 = shalt.err (!%p740_p2)
}
 0x71d   :  { %s744_s16 = scalar_lea.hbm %s964_s4, 128 }
 0x71e   :  { %p745_p3 = scmp.ne.s32.totalorder %s964_s4, %s744_s16  ;;  %p748_p4 = scmp.lt.u32.totalorder %s744_s16, %s964_s4 }
 0x720   :  { %p750_p5 = pnand %p748_p4, %p745_p3 }
 0x722   :  { %753 = shalt.err (!%p750_p5)
}
 0x723   :  { %433 = dma.vmem_to_hbm [thread:$0]  %s431_s0, 128, %s964_s4, [#allocation4]  }
 0x724   :  { %758 = dma.done.wait [#allocation4], 128  }
 0x725   :  { %759 = vsyncadd [#allocation4], 4294967168 }
 0x726   :  { %760 = dma.done.wait [#allocation10], 512  }
 0x727   :  { %761 = vsyncadd [#allocation10], 4294966784 }
 0x728   :  { %467 = vsyncpa [#allocation3], 1 }
 0x729   :  { %468 = vsyncpa [#allocation6], 1 }
 0x72a   :  { %469 = vsyncpa [#allocation4], 1 }
 0x72b   :  { %470 = vsyncpa [#allocation10], 1 }

</bundles_post_ra>
